<compile_context>
chip_gen: v6e
topology: v6e:2x2x1
jax: 0.10.0
libtpu: 0.0.40
codegen_flags: <defaults>
</compile_context>

<pallas_src>
import functools

import jax
import jax.numpy as jnp
from jax.experimental import pallas as pl
from jax.experimental.pallas import tpu as pltpu


def _cdiv(a, b):
    return -(-a // b)


def _round_up(a, b):
    return _cdiv(a, b) * b


@functools.lru_cache(maxsize=1)
def _tpu_generation():
    """Returns (generation tag, VMEM capacity bytes) with safe fallbacks."""
    kind = ""
    try:
        kind = jax.devices()[0].device_kind.lower()
    except Exception:
        pass
    if "v7" in kind:
        gen = "v7"
    elif "v6" in kind:
        gen = "v6"
    elif "v5" in kind:
        gen = "v5"
    else:
        gen = "other"
    vmem = None
    try:
        vmem = int(pltpu.get_tpu_info().vmem_capacity_bytes)
    except Exception:
        pass
    if not vmem or vmem <= 0:
        vmem = (64 << 20) if gen in ("v7", "other") else (128 << 20)
    return gen, vmem


def _kernel_config(N, dp, wbytes, tile_n_override=None):
    """Pick (tile_n, tk, vmem_limit_bytes) for this generation / problem size."""
    gen, vmem_cap = _tpu_generation()
    if gen == "v6":      # 128 MiB VMEM; weight-stream crossover ~650-680 FLOP/B
        tile_max, vmem_budget, min_tiles = 768, min(vmem_cap, 104 << 20), 1
    elif gen == "v5":    # 128 MiB VMEM; crossover ~240 FLOP/B
        tile_max, vmem_budget, min_tiles = 384, min(vmem_cap, 100 << 20), 1
    elif gen == "v7":    # 64 MiB VMEM; crossover ~310 FLOP/B; 2 TensorCores
        tile_max, vmem_budget, min_tiles = 512, min(vmem_cap, 58 << 20), 2
    else:                # unknown backend: conservative
        tile_max, vmem_budget, min_tiles = 256, min(vmem_cap, 56 << 20), 1

    # Hidden-dim tile: 256 matches the 256x256 MXU on v6e/v7x and is free on
    # v5e; keeping it modest leaves VMEM for a larger tile_n (the real lever).
    tk = 256 if dp % 256 == 0 else 128

    def footprint(tn):
        return (2 * 2 * dp * tk * wbytes    # W1 / W2 panels, double-buffered
                + tn * dp * wbytes          # x tile (weights dtype), 1 buffer
                + tn * dp * 4               # out tile (f32 accumulator), 1 buffer
                + 128 * (tk + dp)           # (1, .) bias rows, padded, 2 buffers
                + (2 << 20))                # compiler scratch slack

    if tile_n_override is not None:
        tile_n = max(8, _round_up(min(int(tile_n_override), _round_up(N, 8)), 8))
    else:
        # Enough batch tiles to keep tile_n <= tile_max, at least min_tiles for
        # megacore, never more tiles than 8-row groups (padding <= ~8 rows/tile).
        n_tiles = max(_cdiv(N, tile_max), min_tiles)
        n_tiles = min(n_tiles, max(_cdiv(N, 8), 1))
        tile_n = _round_up(_cdiv(N, n_tiles), 8)
        while tile_n > 8 and footprint(tile_n) > vmem_budget:
            tile_n -= 8

    vmem_limit = int(min(max(footprint(tile_n) + (4 << 20), 32 << 20), vmem_budget))
    return tile_n, tk, vmem_limit


def _single_buffered_spec(block_shape, index_map):
    """BlockSpec whose block index only changes with the batch-tile axis:
    single-buffer it to save a full (tile_n, dp) VMEM buffer."""
    try:
        return pl.BlockSpec(block_shape, index_map, pipeline_mode=pl.Buffered(1))
    except Exception:
        return pl.BlockSpec(block_shape, index_map)


def _residual_block_kernel(x_ref, w1_ref, c1_ref, w2_ref, c2_ref, o_ref):
    """Grid = (batch tile i, hidden tile kb). Hidden axis accumulates into o_ref."""
    kb = pl.program_id(1)

    @pl.when(kb == 0)
    def _init():
        o_ref[...] = jnp.zeros_like(o_ref)

    x = x_ref[...]                                   # (tile_n, dp), weights dtype

    # Linear1 + folded BN1 (column panel kb) + ReLU.  Independent per hidden
    # chunk because bias/BN/ReLU are elementwise over hidden features.
    h = jnp.dot(x, w1_ref[...], preferred_element_type=jnp.float32) + c1_ref[...]
    h = jnp.maximum(h, 0.0)
    # Dropout: identity in eval mode.

    # Linear2 + folded BN2: accumulate partial products directly into o_ref (f32).
    o_ref[...] += jnp.dot(h.astype(w2_ref.dtype), w2_ref[...],
                          preferred_element_type=jnp.float32)

    @pl.when(kb == pl.num_programs(1) - 1)
    def _finalize():
        y = o_ref[...] + c2_ref[...] + x.astype(jnp.float32)   # bias/BN shift + skip
        o_ref[...] = jnp.maximum(y, 0.0)                        # final ReLU


def prepare_params(params, *, weights_dtype=jnp.bfloat16, eps=1e-5):
    """One-time prep: fold BN into weights/biases, transpose, pad to lane/MXU
    granularity, cast weights.  Keep the result around for repeated inference."""
    d = params["w1"].shape[0]
    dp = _round_up(d, 128)                           # lane-dense feature dim

    s1 = params["gamma1"] / jnp.sqrt(params["rv1"] + eps)
    t1 = params["beta1"] - params["rm1"] * s1
    s2 = params["gamma2"] / jnp.sqrt(params["rv2"] + eps)
    t2 = params["beta2"] - params["rm2"] * s2

    # PyTorch Linear is x @ W.T + b; fold BN scale into output columns.
    w1p = params["w1"].T * s1[None, :]               # (d_in, d_out)
    c1 = params["b1"] * s1 + t1
    w2p = params["w2"].T * s2[None, :]
    c2 = params["b2"] * s2 + t2

    pad = dp - d
    w1p = jnp.pad(w1p, ((0, pad), (0, pad))).astype(weights_dtype)
    w2p = jnp.pad(w2p, ((0, pad), (0, pad))).astype(weights_dtype)
    c1 = jnp.pad(c1, (0, pad)).reshape(1, dp).astype(jnp.float32)
    c2 = jnp.pad(c2, (0, pad)).reshape(1, dp).astype(jnp.float32)
    return {"w1": w1p, "c1": c1, "w2": w2p, "c2": c2}


@functools.partial(jax.jit, static_argnames=("tile_n",))
def residual_block(x, prep, *, tile_n=None):
    """Eval-mode forward. x: (N, d) float32; prep: output of prepare_params."""
    N, d = x.shape
    dp = prep["w1"].shape[0]
    w_dtype = prep["w1"].dtype
    wbytes = jnp.dtype(w_dtype).itemsize

    tile_n, tk, vmem_limit = _kernel_config(N, dp, wbytes, tile_n_override=tile_n)
    Np = _round_up(N, tile_n)

    # Pad x to (Np, dp); padded rows/features stay exact zeros through both
    # linears, biases, skip and ReLU (padded columns) and are sliced off.
    x_p = x
    if Np != N or dp != d:
        x_p = jnp.pad(x_p, ((0, Np - N), (0, dp - d)))
    # Hoist the cast out of the per-k loop: cast once in the wrapper (halves
    # x DMA / VMEM when weights are bf16).
    x_p = x_p.astype(w_dtype)

    grid = (Np // tile_n, dp // tk)

    out_p = pl.pallas_call(
        _residual_block_kernel,
        out_shape=jax.ShapeDtypeStruct((Np, dp), jnp.float32),
        grid_spec=pltpu.PrefetchScalarGridSpec(
            num_scalar_prefetch=0,
            grid=grid,
            in_specs=[
                _single_buffered_spec((tile_n, dp), lambda i, k: (i, 0)),  # x (resident over k)
                pl.BlockSpec((dp, tk), lambda i, k: (0, k)),               # W1' column panel
                pl.BlockSpec((1, tk), lambda i, k: (0, k)),                # c1 chunk
                pl.BlockSpec((tk, dp), lambda i, k: (k, 0)),               # W2' row panel
                pl.BlockSpec((1, dp), lambda i, k: (0, 0)),                # c2
            ],
            out_specs=_single_buffered_spec((tile_n, dp), lambda i, k: (i, 0)),
        ),
        compiler_params=pltpu.CompilerParams(
            dimension_semantics=("parallel", "arbitrary"),
            vmem_limit_bytes=vmem_limit,
        ),
    )(x_p, prep["w1"], prep["c1"], prep["w2"], prep["c2"])

    return out_p[:N, :d].astype(x.dtype)


def _make_params(key, d):
    ks = jax.random.split(key, 10)
    bound = 1.0 / jnp.sqrt(d)
    uni = functools.partial(jax.random.uniform, minval=-bound, maxval=bound,
                            dtype=jnp.float32)
    return dict(
        w1=uni(ks[0], (d, d)), b1=uni(ks[1], (d,)),
        gamma1=1.0 + 0.1 * jax.random.normal(ks[2], (d,), jnp.float32),
        beta1=0.1 * jax.random.normal(ks[3], (d,), jnp.float32),
        rm1=0.1 * jax.random.normal(ks[4], (d,), jnp.float32),
        rv1=1.0 + 0.1 * jax.random.uniform(ks[5], (d,), jnp.float32),
        w2=uni(ks[6], (d, d)), b2=uni(ks[7], (d,)),
        gamma2=1.0 + 0.1 * jax.random.normal(ks[8], (d,), jnp.float32),
        beta2=0.1 * jax.random.normal(ks[9], (d,), jnp.float32),
        rm2=jnp.zeros((d,), jnp.float32),
        rv2=jnp.ones((d,), jnp.float32),
    )


def _reference(x, p):
    eps = 1e-5
    h = x @ p["w1"].T + p["b1"]
    h = (h - p["rm1"]) / jnp.sqrt(p["rv1"] + eps) * p["gamma1"] + p["beta1"]
    h = jnp.maximum(h, 0.0)
    y = h @ p["w2"].T + p["b2"]
    y = (y - p["rm2"]) / jnp.sqrt(p["rv2"] + eps) * p["gamma2"] + p["beta2"]
    return jnp.maximum(y + x, 0.0)


if __name__ == "__main__":
    key = jax.random.PRNGKey(0)
    kx, kp, kx2 = jax.random.split(key, 3)

    # Small shape implied by the module: batch=8, hidden d=32 (padded to 128 lanes).
    N, d = 8, 32
    x = jax.random.normal(kx, (N, d), dtype=jnp.float32)
    params = _make_params(kp, d)
    ref = _reference(x, params)

    # 1) f32-weight path: tight check against the reference.
    prep_f32 = prepare_params(params, weights_dtype=jnp.float32)
    out_f32 = jax.block_until_ready(residual_block(x, prep_f32))
    assert out_f32.shape == (N, d)
    if not jnp.allclose(out_f32, ref, atol=1e-5, rtol=1e-5):
        raise AssertionError("f32-weight Pallas output does not match reference")

    # 2) bf16-weight path (default, 2x MXU throughput): loose check.
    prep_bf16 = prepare_params(params)
    out_bf16 = jax.block_until_ready(residual_block(x, prep_bf16))
    if not jnp.allclose(out_bf16, ref, atol=5e-2, rtol=5e-2):
        raise AssertionError("bf16-weight Pallas output does not match reference")

    # 3) Larger shape exercising batch tiling, hidden-dim accumulation and padding.
    N2, d2 = 520, 320
    x2 = jax.random.normal(kx2, (N2, d2), dtype=jnp.float32)
    params2 = _make_params(jax.random.PRNGKey(1), d2)
    prep2 = prepare_params(params2)                     # bf16 weights
    out2 = jax.block_until_ready(residual_block(x2, prep2))
    ref2 = _reference(x2, params2)
    if not jnp.allclose(out2, ref2, atol=5e-2, rtol=5e-2):
        raise AssertionError("tiled bf16 Pallas output does not match reference")

    print("KERNEL_OK")
</pallas_src>

<mosaic_0001>
module attributes {stable_mosaic.version = 11 : i64} {
  func.func @_residual_block_kernel(%arg0: i32, %arg1: i32, %arg2: memref<8x128xf32, #tpu.memory_space<vmem>>, %arg3: memref<128x128xf32, #tpu.memory_space<vmem>>, %arg4: memref<1x128xf32, #tpu.memory_space<vmem>>, %arg5: memref<128x128xf32, #tpu.memory_space<vmem>>, %arg6: memref<1x128xf32, #tpu.memory_space<vmem>>, %arg7: memref<8x128xf32, #tpu.memory_space<vmem>>) attributes {dimension_semantics = [#tpu.dimension_semantics<parallel>, #tpu.dimension_semantics<arbitrary>], iteration_bounds = array<i64: 1, 1>, scalar_prefetch = 0 : i64, scratch_operands = 0 : i64, tpu.core_type = #tpu.core_type<tc>, window_params = [{pipeline_mode = #tpu.pipeline_mode<synchronous>, transform_indices = @transform_0, window_bounds = array<i64: 8, 128>}, {transform_indices = @transform_1, window_bounds = array<i64: 128, 128>}, {transform_indices = @transform_2, window_bounds = array<i64: 1, 128>}, {transform_indices = @transform_3, window_bounds = array<i64: 128, 128>}, {pipeline_mode = #tpu.pipeline_mode<synchronous>, transform_indices = @transform_4, window_bounds = array<i64: 1, 128>}, {pipeline_mode = #tpu.pipeline_mode<synchronous>, transform_indices = @transform_5, window_bounds = array<i64: 8, 128>}]} {
    %c0_i32 = arith.constant 0 : i32
    %0 = arith.cmpi eq, %arg1, %c0_i32 : i32
    %1 = arith.extui %0 : i1 to i32
    %c0_i32_0 = arith.constant 0 : i32
    %2 = arith.cmpi ne, %1, %c0_i32_0 : i32
    scf.if %2 {
      %cst_16 = arith.constant 0.000000e+00 : f32
      %19 = vector.broadcast %cst_16 : f32 to vector<8x128xf32>
      %c0_17 = arith.constant 0 : index
      %c0_18 = arith.constant 0 : index
      %20 = vector.load %arg7[%c0_17, %c0_18] : memref<8x128xf32, #tpu.memory_space<vmem>>, vector<8x128xf32>
      tpu.vector_store %arg7[%c0_17, %c0_18], %19 {strides = array<i32>} : memref<8x128xf32, #tpu.memory_space<vmem>>, vector<8x128xf32>,
    } else {
    }
    %c0 = arith.constant 0 : index
    %c0_1 = arith.constant 0 : index
    %3 = vector.load %arg2[%c0, %c0_1] : memref<8x128xf32, #tpu.memory_space<vmem>>, vector<8x128xf32>
    %c0_2 = arith.constant 0 : index
    %c0_3 = arith.constant 0 : index
    %4 = vector.load %arg3[%c0_2, %c0_3] : memref<128x128xf32, #tpu.memory_space<vmem>>, vector<128x128xf32>
    %cst = arith.constant dense<0.000000e+00> : vector<8x128xf32>
    %5 = tpu.matmul %3, %4, %cst {dimension_numbers = #tpu.dot_dimension_numbers<[1], [0], [0], [1], [0, 0, 1, 1], [], []>} : vector<8x128xf32>, vector<128x128xf32>, vector<8x128xf32> -> vector<8x128xf32>
    %c0_4 = arith.constant 0 : index
    %c0_5 = arith.constant 0 : index
    %6 = vector.load %arg4[%c0_4, %c0_5] : memref<1x128xf32, #tpu.memory_space<vmem>>, vector<1x128xf32>
    %7 = vector.broadcast %6 : vector<1x128xf32> to vector<8x128xf32>
    %8 = arith.addf %5, %7 : vector<8x128xf32>
    %cst_6 = arith.constant 0.000000e+00 : f32
    %9 = vector.broadcast %cst_6 : f32 to vector<8x128xf32>
    %10 = arith.maximumf %8, %9 : vector<8x128xf32>
    %c0_7 = arith.constant 0 : index
    %c0_8 = arith.constant 0 : index
    %11 = vector.load %arg7[%c0_7, %c0_8] : memref<8x128xf32, #tpu.memory_space<vmem>>, vector<8x128xf32>
    %c0_9 = arith.constant 0 : index
    %c0_10 = arith.constant 0 : index
    %12 = vector.load %arg5[%c0_9, %c0_10] : memref<128x128xf32, #tpu.memory_space<vmem>>, vector<128x128xf32>
    %cst_11 = arith.constant dense<0.000000e+00> : vector<8x128xf32>
    %13 = tpu.matmul %10, %12, %cst_11 {dimension_numbers = #tpu.dot_dimension_numbers<[1], [0], [0], [1], [0, 0, 1, 1], [], []>} : vector<8x128xf32>, vector<128x128xf32>, vector<8x128xf32> -> vector<8x128xf32>
    %14 = arith.addf %11, %13 : vector<8x128xf32>
    %c0_12 = arith.constant 0 : index
    %c0_13 = arith.constant 0 : index
    %15 = vector.load %arg7[%c0_12, %c0_13] : memref<8x128xf32, #tpu.memory_space<vmem>>, vector<8x128xf32>
    tpu.vector_store %arg7[%c0_12, %c0_13], %14 {strides = array<i32>} : memref<8x128xf32, #tpu.memory_space<vmem>>, vector<8x128xf32>,
    %c0_i32_14 = arith.constant 0 : i32
    %16 = arith.cmpi eq, %arg1, %c0_i32_14 : i32
    %17 = arith.extui %16 : i1 to i32
    %c0_i32_15 = arith.constant 0 : i32
    %18 = arith.cmpi ne, %17, %c0_i32_15 : i32
    scf.if %18 {
      %c0_16 = arith.constant 0 : index
      %c0_17 = arith.constant 0 : index
      %19 = vector.load %arg7[%c0_16, %c0_17] : memref<8x128xf32, #tpu.memory_space<vmem>>, vector<8x128xf32>
      %c0_18 = arith.constant 0 : index
      %c0_19 = arith.constant 0 : index
      %20 = vector.load %arg6[%c0_18, %c0_19] : memref<1x128xf32, #tpu.memory_space<vmem>>, vector<1x128xf32>
      %21 = vector.broadcast %20 : vector<1x128xf32> to vector<8x128xf32>
      %22 = arith.addf %19, %21 : vector<8x128xf32>
      %23 = arith.addf %22, %3 : vector<8x128xf32>
      %cst_20 = arith.constant 0.000000e+00 : f32
      %24 = vector.broadcast %cst_20 : f32 to vector<8x128xf32>
      %25 = arith.maximumf %23, %24 : vector<8x128xf32>
      %c0_21 = arith.constant 0 : index
      %c0_22 = arith.constant 0 : index
      %26 = vector.load %arg7[%c0_21, %c0_22] : memref<8x128xf32, #tpu.memory_space<vmem>>, vector<8x128xf32>
      tpu.vector_store %arg7[%c0_21, %c0_22], %25 {strides = array<i32>} : memref<8x128xf32, #tpu.memory_space<vmem>>, vector<8x128xf32>,
    } else {
    }
    return
  }
  func.func @transform_0(%arg0: i32, %arg1: i32) -> (i32, i32) {
    %c0_i32 = arith.constant 0 : i32
    %c0_i32_0 = arith.constant 0 : i32
    return %arg0, %c0_i32 : i32, i32
  }
  func.func @transform_1(%arg0: i32, %arg1: i32) -> (i32, i32) {
    %c0_i32 = arith.constant 0 : i32
    %c0_i32_0 = arith.constant 0 : i32
    return %c0_i32, %arg1 : i32, i32
  }
  func.func @transform_2(%arg0: i32, %arg1: i32) -> (i32, i32) {
    %c0_i32 = arith.constant 0 : i32
    %c0_i32_0 = arith.constant 0 : i32
    return %c0_i32, %arg1 : i32, i32
  }
  func.func @transform_3(%arg0: i32, %arg1: i32) -> (i32, i32) {
    %c0_i32 = arith.constant 0 : i32
    %c0_i32_0 = arith.constant 0 : i32
    return %arg1, %c0_i32 : i32, i32
  }
  func.func @transform_4(%arg0: i32, %arg1: i32) -> (i32, i32) {
    %c0_i32 = arith.constant 0 : i32
    %c0_i32_0 = arith.constant 0 : i32
    %c0_i32_1 = arith.constant 0 : i32
    return %c0_i32, %c0_i32_0 : i32, i32
  }
  func.func @transform_5(%arg0: i32, %arg1: i32) -> (i32, i32) {
    %c0_i32 = arith.constant 0 : i32
    %c0_i32_0 = arith.constant 0 : i32
    return %arg0, %c0_i32 : i32, i32
  }
}

</mosaic_0001>

<bundles_post_ra>
// kernel: residual_block.1
= control target key start
LH: loop header
LB: loop body
LE: loop exit
PB: predicated region body
PF: predicated region fallthrough
CT: control target
= control target key end

     0   :  { %10 = vsyncpa [#allocation3], 0  ;;  %s537_s0 = inlined_call_operand.vmem [shape: f32[8,128], index: 0, kind: input, shape index: {}]   ;;  %s538_s1 = inlined_call_operand.hbm [shape: f32[128,128], index: 1, kind: input, shape index: {}]   ;;  %s539_s2 = inlined_call_operand.vmem [shape: f32[1,128], index: 2, kind: input, shape index: {}]   ;;  %s540_s3 = inlined_call_operand.hbm [shape: f32[128,128], index: 3, kind: input, shape index: {}]   ;;  %s541_s4 = inlined_call_operand.vmem [shape: f32[1,128], index: 4, kind: input, shape index: {}]   ;;  %s542_s5 = inlined_call_operand.hbm [shape: f32[8,128], index: 5, kind: output, shape index: {}]  }
   0x1   :  { %11 = vsyncpa [#allocation6], 0 }
   0x2   :  { %12 = vsyncpa [#allocation4], 0  ;;  %s448_s18 = smov [#allocation2]  }
   0x3   :  { %s20_s19 = sshll.u32 %s448_s18, 4  ;;  %s21_s19 = int_to_ptr.vmem [resolvable:$true] %s20_s19 }
   0x4   :  { %s390_s20 = scalar_lea.vmem %s21_s19, 2048  ;;  %p395_p1 = scmp.lt.s32.totalorder %s21_s19, %s21_s19 }
   0x5   :  { %p391_p0 = scmp.ne.s32.totalorder %s21_s19, %s390_s20  ;;  %p396_p2 = scmp.lt.s32.totalorder %s390_s20, %s390_s20 }
   0x7   :  { %p397_p3 = por %p396_p2, %p395_p1 }
   0x9   :  { %p398_p4 = pnand %p397_p3, %p391_p0 }
   0xb   :  { %401 = shalt.err (!%p398_p4)
}
   0xc   :  { %s449_s21 = smov 128   ;;  %s450_s22 = smov 8  }
   0xd   :  { %26 = dma.hbm_to_vmem [thread:$0]  %s538_s1, 2048, %s21_s19, [#allocation3], %s449_s21, %s449_s21, %s450_s22  }
   0xe   :  { %s451_s25 = smov [#allocation5]  }
   0xf   :  { %s34_s26 = sshll.u32 %s451_s25, 4  ;;  %s35_s26 = int_to_ptr.vmem [resolvable:$true] %s34_s26 }
  0x10   :  { %s410_s27 = scalar_lea.vmem %s35_s26, 2048  ;;  %p415_p6 = scmp.lt.s32.totalorder %s35_s26, %s35_s26 }
  0x11   :  { %p411_p5 = scmp.ne.s32.totalorder %s35_s26, %s410_s27  ;;  %p416_p7 = scmp.lt.s32.totalorder %s410_s27, %s410_s27 }
  0x13   :  { %p417_p8 = por %p416_p7, %p415_p6 }
  0x15   :  { %p418_p9 = pnand %p417_p8, %p411_p5 }
  0x17   :  { %421 = shalt.err (!%p418_p9)
}
  0x18   :  { %40 = dma.hbm_to_vmem [thread:$0]  %s540_s3, 2048, %s35_s26, [#allocation6], %s449_s21, %s449_s21, %s450_s22  }
  0x19   :  { %442 = dma.done.wait [#allocation3], 2048  }
  0x1a   :  { %443 = vsyncadd [#allocation3], 4294965248 }
  0x1b   :  { %444 = dma.done.wait [#allocation6], 2048  }
  0x1c   :  { %445 = vsyncadd [#allocation6], 4294965248  ;;  %v452_v0 = vmov 0.0   ;;  %vm453_vm0 = vmmov 0   ;;  %v70_v1 = vld [vmem:[#allocation2 + $0x78] sm:$0xff]  ;;  %v69_v2 = vld [vmem:[#allocation2 + $0x70] sm:$0xff] }
  0x1d   :  { %305 = vmatprep.subr.mxu0 %v452_v0  ;;  %337 = vmatprep.mubr.msk.f32.mxu0 %vm453_vm0, %v452_v0  ;;  %v68_v3 = vld [vmem:[#allocation2 + $0x68] sm:$0xff]  ;;  %v67_v4 = vld [vmem:[#allocation2 + $0x60] sm:$0xff]  ;;  %v165_v5 = vld [vmem:[#allocation5 + $0x78] sm:$0xff]  ;;  %s454_s8 = smov [#allocation7]  }
  0x1e   :  { %340 = vmatprep.subr.mxu1 %v452_v0  ;;  %372 = vmatprep.mubr.msk.f32.mxu1 %vm453_vm0, %v452_v0  ;;  %v66_v6 = vld [vmem:[#allocation2 + $0x58] sm:$0xff]  ;;  %v164_v7 = vld [vmem:[#allocation5 + $0x70] sm:$0xff]  ;;  %v163_v8 = vld [vmem:[#allocation5 + $0x68] sm:$0xff]  ;;  %s259_s9 = sshll.u32 %s454_s8, 4  ;;  %s260_s9 = int_to_ptr.vmem [resolvable:$true] %s259_s9 }
  0x1f   :  { %306 = vmatpush3.msra.mxu0 %v70_v1  ;;  %341 = vmatpush3.msra.mxu1 %v165_v5  ;;  %v65_v9 = vld [vmem:[#allocation2 + $0x50] sm:$0xff]  ;;  %v162_v10 = vld [vmem:[#allocation5 + $0x60] sm:$0xff]  ;;  %v64_v11 = vld [vmem:[#allocation2 + $0x48] sm:$0xff]  ;;  %s422_s10 = scalar_lea.vmem %s260_s9, 128  ;;  %p427_p11 = scmp.lt.s32.totalorder %s260_s9, %s260_s9 }
  0x20   :  { %307 = vmatprep.subr.mxu0 %v452_v0  ;;  %342 = vmatprep.subr.mxu1 %v452_v0  ;;  %v161_v12 = vld [vmem:[#allocation5 + $0x58] sm:$0xff]  ;;  %v63_v13 = vld [vmem:[#allocation2 + $0x40] sm:$0xff]  ;;  %v160_v14 = vld [vmem:[#allocation5 + $0x50] sm:$0xff]  ;;  %p423_p10 = scmp.ne.s32.totalorder %s260_s9, %s422_s10  ;;  %p428_p12 = scmp.lt.s32.totalorder %s422_s10, %s422_s10 }
  0x21   :  { %308 = vmatpush3.msra.mxu0 %v69_v2  ;;  %343 = vmatpush3.msra.mxu1 %v164_v7  ;;  %v62_v15 = vld [vmem:[#allocation2 + $0x38] sm:$0xff]  ;;  %v159_v16 = vld [vmem:[#allocation5 + $0x48] sm:$0xff]  ;;  %v61_v17 = vld [vmem:[#allocation2 + $0x30] sm:$0xff] }
  0x22   :  { %309 = vmatprep.subr.mxu0 %v452_v0  ;;  %344 = vmatprep.subr.mxu1 %v452_v0  ;;  %v158_v18 = vld [vmem:[#allocation5 + $0x40] sm:$0xff]  ;;  %v60_v19 = vld [vmem:[#allocation2 + $0x28] sm:$0xff]  ;;  %v157_v20 = vld [vmem:[#allocation5 + $0x38] sm:$0xff]  ;;  %p429_p13 = por %p428_p12, %p427_p11 }
  0x23   :  { %310 = vmatpush3.msra.mxu0 %v68_v3  ;;  %345 = vmatpush3.msra.mxu1 %v163_v8  ;;  %v59_v21 = vld [vmem:[#allocation2 + $0x20] sm:$0xff]  ;;  %v156_v22 = vld [vmem:[#allocation5 + $0x30] sm:$0xff]  ;;  %v58_v23 = vld [vmem:[#allocation2 + $0x18] sm:$0xff] }
  0x24   :  { %311 = vmatprep.subr.mxu0 %v452_v0  ;;  %346 = vmatprep.subr.mxu1 %v452_v0  ;;  %v155_v24 = vld [vmem:[#allocation5 + $0x28] sm:$0xff]  ;;  %v57_v25 = vld [vmem:[#allocation2 + $0x10] sm:$0xff]  ;;  %v154_v26 = vld [vmem:[#allocation5 + $0x20] sm:$0xff]  ;;  %p430_p0 = pnand %p429_p13, %p423_p10 }
  0x25   :  { %312 = vmatpush3.msra.mxu0 %v67_v4  ;;  %347 = vmatpush3.msra.mxu1 %v162_v10  ;;  %v56_v27 = vld [vmem:[#allocation2 + $0x8] sm:$0xff]  ;;  %v153_v28 = vld [vmem:[#allocation5 + $0x18] sm:$0xff]  ;;  %v55_v29 = vld [vmem:[#allocation2] sm:$0xff] }
  0x26   :  { %313 = vmatprep.subr.mxu0 %v452_v0  ;;  %348 = vmatprep.subr.mxu1 %v452_v0  ;;  %v54_v30 = vld [vmem:[%s537_s0] sm:$0xff]  ;;  %v152_v31 = vld [vmem:[#allocation5 + $0x10] sm:$0xff]  ;;  %v151_v32 = vld [vmem:[#allocation5 + $0x8] sm:$0xff] }
  0x27   :  { %314 = vmatpush3.msra.mxu0 %v66_v6  ;;  %349 = vmatpush3.msra.mxu1 %v161_v12  ;;  %v150_v33 = vld [vmem:[#allocation5] sm:$0xff] }
  0x28   :  { %315 = vmatprep.subr.mxu0 %v452_v0  ;;  %350 = vmatprep.subr.mxu1 %v452_v0  ;;  %v269_v34 = vld [vmem:[%s539_s2] ss:$0 sm:$0xff] }
  0x29   :  { %316 = vmatpush3.msra.mxu0 %v65_v9  ;;  %351 = vmatpush3.msra.mxu1 %v160_v14  ;;  %v270_v40 = vld [vmem:[%s541_s4] ss:$0 sm:$0xff] }
  0x2a   :  { %317 = vmatprep.subr.mxu0 %v452_v0  ;;  %352 = vmatprep.subr.mxu1 %v452_v0 }
  0x2b   :  { %318 = vmatpush3.msra.mxu0 %v64_v11  ;;  %353 = vmatpush3.msra.mxu1 %v159_v16 }
  0x2c   :  { %319 = vmatprep.subr.mxu0 %v452_v0  ;;  %354 = vmatprep.subr.mxu1 %v452_v0 }
  0x2d   :  { %320 = vmatpush3.msra.mxu0 %v63_v13  ;;  %355 = vmatpush3.msra.mxu1 %v158_v18 }
  0x2e   :  { %321 = vmatprep.subr.mxu0 %v452_v0  ;;  %356 = vmatprep.subr.mxu1 %v452_v0 }
  0x2f   :  { %322 = vmatpush3.msra.mxu0 %v62_v15  ;;  %357 = vmatpush3.msra.mxu1 %v157_v20 }
  0x30   :  { %323 = vmatprep.subr.mxu0 %v452_v0  ;;  %358 = vmatprep.subr.mxu1 %v452_v0 }
  0x31   :  { %324 = vmatpush3.msra.mxu0 %v61_v17  ;;  %359 = vmatpush3.msra.mxu1 %v156_v22 }
  0x32   :  { %325 = vmatprep.subr.mxu0 %v452_v0  ;;  %360 = vmatprep.subr.mxu1 %v452_v0 }
  0x33   :  { %326 = vmatpush3.msra.mxu0 %v60_v19  ;;  %361 = vmatpush3.msra.mxu1 %v155_v24 }
  0x34   :  { %327 = vmatprep.subr.mxu0 %v452_v0  ;;  %362 = vmatprep.subr.mxu1 %v452_v0 }
  0x35   :  { %328 = vmatpush3.msra.mxu0 %v59_v21  ;;  %363 = vmatpush3.msra.mxu1 %v154_v26 }
  0x36   :  { %329 = vmatprep.subr.mxu0 %v452_v0  ;;  %364 = vmatprep.subr.mxu1 %v452_v0 }
  0x37   :  { %330 = vmatpush3.msra.mxu0 %v58_v23  ;;  %365 = vmatpush3.msra.mxu1 %v153_v28 }
  0x38   :  { %331 = vmatprep.subr.mxu0 %v452_v0  ;;  %366 = vmatprep.subr.mxu1 %v452_v0 }
  0x39   :  { %332 = vmatpush3.msra.mxu0 %v57_v25  ;;  %367 = vmatpush3.msra.mxu1 %v152_v31 }
  0x3a   :  { %333 = vmatprep.subr.mxu0 %v452_v0  ;;  %368 = vmatprep.subr.mxu1 %v452_v0 }
  0x3b   :  { %334 = vmatpush3.msra.mxu0 %v56_v27  ;;  %369 = vmatpush3.msra.mxu1 %v151_v32 }
  0x3c   :  { %335 = vmatprep.subr.mxu0 %v452_v0  ;;  %370 = vmatprep.subr.mxu1 %v452_v0 }
  0x3d   :  { %336 = vmatpush3.msra.mxu0 %v55_v29  ;;  %371 = vmatpush3.msra.mxu1 %v150_v33 }
  0x3e   :  { %338 = vmatmul.mubr.f32.vlgmr.msra.gmra.mxu0 %v54_v30 }
  0xfe   :  { %v144_v35 = vpop.f32.mrf.mxu0 }
  0xff   :  { %v145_v36 = vadd.f32 %v269_v34, %v144_v35 }
 0x100   :  { %v339_v37 = vpop.f32.mrf.mxu0 }
 0x101   :  { %v148_v38 = vmax.f32 %v145_v36, 0.0 }
 0x103   :  { %373 = vmatmul.mubr.f32.vlgmr.msra.gmra.mxu1 %v148_v38 }
 0x1c3   :  { %v232_v39 = vpop.f32.mrf.mxu1 }
 0x1c4   :  { %v249_v42 = vadd.f32 %v270_v40, %v232_v39 }
 0x1c5   :  { %v374_v41 = vpop.f32.mrf.mxu1 }
 0x1c6   :  { %v250_v43 = vadd.f32 %v249_v42, %v54_v30 }
 0x1c8   :  { %v251_v44 = vmax.f32 %v250_v43, 0.0 }
 0x1ca   :  { %252 = vst [vmem:[#allocation7] sm:$0xff] %v251_v44 }
 0x1cb   :  { %433 = shalt.err (!%p430_p0)
}
 0x1cc   :  { %262 = dma.vmem_to_hbm [thread:$0]  %s260_s9, 128, %s542_s5, [#allocation4]  }
 0x1cd   :  { %446 = dma.done.wait [#allocation4], 128  }
 0x1ce   :  { %447 = vsyncadd [#allocation4], 4294967168 }
 0x1cf   :  { %266 = vsyncpa [#allocation3], 1 }
 0x1d0   :  { %267 = vsyncpa [#allocation6], 1 }
 0x1d1   :  { %268 = vsyncpa [#allocation4], 1 }

</bundles_post_ra>
